<compile_context>
chip_gen: v7x
topology: tpu7x:2x2x1
jax: 0.10.0
libtpu: 0.0.40
codegen_flags: <defaults>
</compile_context>

<pallas_src>
import math
import jax
import jax.numpy as jnp
from jax.experimental import pallas as pl
from jax.experimental.pallas import tpu as pltpu

# ---- module-consistent hyper-parameters --------------------------------------
B, S = 2, 8
HID_DIM = 32
N_HEADS = 4
HEAD_DIM = HID_DIM // N_HEADS
PF_DIM = 64

LN_EPS = 1e-5                           # nn.LayerNorm default
ATT_SCALE = 1.0 / math.sqrt(HEAD_DIM)   # nn.MultiheadAttention scaling
NEG_INF = -1e30                         # additive key_padding_mask value

# ---- packed parameter layout (built once at init; zero per-call cost) ---------
# All row offsets are multiples of 8 so in-kernel slices stay sublane-aligned.
PACK_COLS = 3 * HID_DIM                  # 96
R_WQKV = 0                               # (HID_DIM, 3*HID_DIM)   rows   0:32
R_WO = R_WQKV + HID_DIM                  # (HID_DIM, HID_DIM)     rows  32:64
R_W1 = R_WO + HID_DIM                    # (HID_DIM, PF_DIM)      rows  64:96
R_W2 = R_W1 + HID_DIM                    # (PF_DIM, HID_DIM)      rows  96:160
R_VEC = R_W2 + PF_DIM                    # 8 vector rows          rows 160:168
PACK_ROWS = R_VEC + 8                    # 168
V_BQKV, V_BO, V_BF1, V_BF2, V_G1, V_B1, V_G2, V_B2 = range(8)


def _vmem_spec():
    # whole-array blocks resident in VMEM (total footprint << 1 MiB)
    return pl.BlockSpec(memory_space=pltpu.MemorySpace.VMEM)


def _layer_norm(x2, gamma, beta):
    # x2: (R, H); biased variance, like PyTorch LayerNorm
    mu = jnp.mean(x2, axis=-1, keepdims=True)
    var = jnp.mean((x2 - mu) ** 2, axis=-1, keepdims=True)
    return gamma * (x2 - mu) * jax.lax.rsqrt(var + LN_EPS) + beta


# ---------------------------- fused Pallas kernel ------------------------------
def _encoder_layer_kernel(x_ref, mask_ref, p_ref, o_ref):
    def vec(idx, n):                     # (1, n) bias / LN vector row
        r = R_VEC + idx
        return p_ref[r:r + 1, 0:n]

    x = x_ref[...]                                   # (B, S, H)
    mask = mask_ref[...]                             # (B, 1, S) additive mask
    x2 = x.reshape(B * S, HID_DIM)

    # --- fused QKV projection (scale pre-folded into Q columns at pack time) ---
    wqkv = p_ref[R_WQKV:R_WQKV + HID_DIM, :]                     # (H, 3H)
    qkv = jnp.dot(x2, wqkv,
                  preferred_element_type=jnp.float32) + vec(V_BQKV, 3 * HID_DIM)

    # --- per-head attention core (unrolled, NH=4; tiny 3-D batched einsums) ----
    mask_full = jnp.broadcast_to(mask, (B, S, S))    # hoisted broadcast
    ctx_heads = []
    for h in range(N_HEADS):
        lo = h * HEAD_DIM
        qh = qkv[:, lo:lo + HEAD_DIM].reshape(B, S, HEAD_DIM)
        kh = qkv[:, HID_DIM + lo:HID_DIM + lo + HEAD_DIM].reshape(B, S, HEAD_DIM)
        vh = qkv[:, 2 * HID_DIM + lo:2 * HID_DIM + lo + HEAD_DIM].reshape(B, S, HEAD_DIM)

        s = jnp.einsum('bqd,bkd->bqk', qh, kh,
                       preferred_element_type=jnp.float32) + mask_full   # (B, S, S)
        m = jnp.max(s, axis=-1, keepdims=True)
        p = jnp.exp(s - m)
        # reciprocal on the EUP slot instead of a VPU f32 divide
        p = p * pl.reciprocal(jnp.sum(p, axis=-1, keepdims=True), approx=True)
        ctx_heads.append(jnp.einsum('bqk,bkd->bqd', p, vh,
                                    preferred_element_type=jnp.float32))

    ctx = jnp.concatenate(ctx_heads, axis=-1).reshape(B * S, HID_DIM)    # concat heads

    # --- single output projection ----------------------------------------------
    wo = p_ref[R_WO:R_WO + HID_DIM, 0:HID_DIM]
    attn = jnp.dot(ctx, wo,
                   preferred_element_type=jnp.float32) + vec(V_BO, HID_DIM)

    # --- residual + LayerNorm (dropout == identity in eval mode) ---------------
    y = _layer_norm(x2 + attn, vec(V_G1, HID_DIM), vec(V_B1, HID_DIM))

    # --- position-wise FFN: Linear -> ReLU -> Linear ---------------------------
    w1 = p_ref[R_W1:R_W1 + HID_DIM, 0:PF_DIM]
    w2 = p_ref[R_W2:R_W2 + PF_DIM, 0:HID_DIM]
    ff = jnp.maximum(jnp.dot(y, w1,
                             preferred_element_type=jnp.float32) + vec(V_BF1, PF_DIM), 0.0)
    ff = jnp.dot(ff, w2,
                 preferred_element_type=jnp.float32) + vec(V_BF2, HID_DIM)

    o_ref[...] = _layer_norm(y + ff, vec(V_G2, HID_DIM),
                             vec(V_B2, HID_DIM)).reshape(B, S, HID_DIM)


# ---------------------------- wrapper ------------------------------------------
@jax.jit
def encoder_layer_forward(seq, seq_mask, packed_params):
    # seq_mask: bool (B, S), True = padded (PyTorch key_padding_mask convention)
    mask_add = jnp.where(seq_mask, NEG_INF, 0.0).astype(jnp.float32)[:, None, :]
    return pl.pallas_call(
        _encoder_layer_kernel,
        out_shape=jax.ShapeDtypeStruct((B, S, HID_DIM), jnp.float32),
        in_specs=[_vmem_spec()] * 3,
        out_specs=_vmem_spec(),
    )(seq, mask_add, packed_params)


# ---------------------------- params --------------------------------------------
def init_params(key):
    kit = iter(jax.random.split(key, 32))

    def nrm(shape, std=0.1):
        return (std * jax.random.normal(next(kit), shape)).astype(jnp.float32)

    return {
        # fused in_proj: columns [0:H]=Wq, [H:2H]=Wk, [2H:3H]=Wv (heads contiguous)
        'wqkv': nrm((HID_DIM, 3 * HID_DIM)), 'bqkv': nrm((1, 3 * HID_DIM)),
        'wo': nrm((HID_DIM, HID_DIM)),       'bo': nrm((1, HID_DIM)),
        'g1': jnp.ones((1, HID_DIM), jnp.float32), 'b1': jnp.zeros((1, HID_DIM), jnp.float32),
        'w1': nrm((HID_DIM, PF_DIM)),        'bf1': nrm((1, PF_DIM)),
        'w2': nrm((PF_DIM, HID_DIM)),        'bf2': nrm((1, HID_DIM)),
        'g2': jnp.ones((1, HID_DIM), jnp.float32), 'b2': jnp.zeros((1, HID_DIM), jnp.float32),
    }


def pack_params(p):
    """Pack all weights/biases/LN params into one (168, 96) buffer (init-time only)."""
    # Fold the attention scale into the Q slice of the fused QKV projection:
    # (x @ Wq + bq) * s == x @ (s*Wq) + s*bq  — exactly equivalent.
    wqkv = p['wqkv'].at[:, :HID_DIM].multiply(ATT_SCALE)
    bqkv = p['bqkv'].at[:, :HID_DIM].multiply(ATT_SCALE)

    buf = jnp.zeros((PACK_ROWS, PACK_COLS), jnp.float32)
    buf = buf.at[R_WQKV:R_WQKV + HID_DIM, :3 * HID_DIM].set(wqkv)
    buf = buf.at[R_WO:R_WO + HID_DIM, :HID_DIM].set(p['wo'])
    buf = buf.at[R_W1:R_W1 + HID_DIM, :PF_DIM].set(p['w1'])
    buf = buf.at[R_W2:R_W2 + PF_DIM, :HID_DIM].set(p['w2'])
    for idx, v in ((V_BQKV, bqkv), (V_BO, p['bo']), (V_BF1, p['bf1']), (V_BF2, p['bf2']),
                   (V_G1, p['g1']), (V_B1, p['b1']), (V_G2, p['g2']), (V_B2, p['b2'])):
        buf = buf.at[R_VEC + idx, :v.shape[-1]].set(v[0])
    return buf


# ---------------------------- pure-JAX reference -------------------------------
def reference_forward(seq, seq_mask, p):
    mask_add = jnp.where(seq_mask, NEG_INF, 0.0).astype(jnp.float32)      # (B, S)
    x2 = seq.reshape(B * S, HID_DIM)

    qkv = x2 @ p['wqkv'] + p['bqkv']
    q, k, v = jnp.split(qkv, 3, axis=-1)
    q = q.reshape(B, S, N_HEADS, HEAD_DIM)
    k = k.reshape(B, S, N_HEADS, HEAD_DIM)
    v = v.reshape(B, S, N_HEADS, HEAD_DIM)

    s = jnp.einsum('bqhd,bkhd->bhqk', q * ATT_SCALE, k) + mask_add[:, None, None, :]
    pattn = jax.nn.softmax(s, axis=-1)
    ctx = jnp.einsum('bhqk,bkhd->bqhd', pattn, v).reshape(B * S, HID_DIM)

    attn = ctx @ p['wo'] + p['bo']
    y = _layer_norm(x2 + attn, p['g1'], p['b1'])
    ff = jnp.maximum(y @ p['w1'] + p['bf1'], 0.0)
    ff = ff @ p['w2'] + p['bf2']
    return _layer_norm(y + ff, p['g2'], p['b2']).reshape(B, S, HID_DIM)


if __name__ == "__main__":
    key = jax.random.PRNGKey(0)
    kx, kp = jax.random.split(key)

    seq = jax.random.normal(kx, (B, S, HID_DIM), dtype=jnp.float32)
    # key_padding_mask: True = ignore (padded). Pad the last two positions of batch 1.
    seq_mask = jnp.zeros((B, S), dtype=jnp.bool_).at[1, -2:].set(True)

    params = init_params(kp)
    packed = jax.block_until_ready(pack_params(params))   # one-time packing

    out = jax.block_until_ready(encoder_layer_forward(seq, seq_mask, packed))
    ref = reference_forward(seq, seq_mask, params)

    assert out.shape == (B, S, HID_DIM)
    if not jnp.allclose(out, ref, rtol=2e-2, atol=2e-2):
        raise AssertionError("Pallas output does not match JAX reference")

    print("KERNEL_OK")
</pallas_src>

<mosaic_0001>
module attributes {stable_mosaic.version = 11 : i64} {
  func.func @_encoder_layer_kernel(%arg0: memref<2x8x32xf32, #tpu.memory_space<vmem>>, %arg1: memref<2x1x8xf32, #tpu.memory_space<vmem>>, %arg2: memref<168x96xf32, #tpu.memory_space<vmem>>, %arg3: memref<2x8x32xf32, #tpu.memory_space<vmem>>) attributes {dimension_semantics = [], scalar_prefetch = 0 : i64, scratch_operands = 0 : i64, tpu.core_type = #tpu.core_type<tc>} {
    %c0 = arith.constant 0 : index
    %c0_0 = arith.constant 0 : index
    %c0_1 = arith.constant 0 : index
    %0 = vector.load %arg0[%c0, %c0_0, %c0_1] : memref<2x8x32xf32, #tpu.memory_space<vmem>>, vector<2x8x32xf32>
    %c0_2 = arith.constant 0 : index
    %c0_3 = arith.constant 0 : index
    %c0_4 = arith.constant 0 : index
    %1 = vector.load %arg1[%c0_2, %c0_3, %c0_4] : memref<2x1x8xf32, #tpu.memory_space<vmem>>, vector<2x1x8xf32>
    %2 = vector.shape_cast %0 : vector<2x8x32xf32> to vector<16x32xf32>
    %c0_5 = arith.constant 0 : index
    %c0_6 = arith.constant 0 : index
    %3 = vector.load %arg2[%c0_5, %c0_6] : memref<168x96xf32, #tpu.memory_space<vmem>>, vector<32x96xf32>
    %cst = arith.constant dense<0.000000e+00> : vector<16x96xf32>
    %4 = tpu.matmul %2, %3, %cst {dimension_numbers = #tpu.dot_dimension_numbers<[1], [0], [0], [1], [0, 0, 1, 1], [], []>} : vector<16x32xf32>, vector<32x96xf32>, vector<16x96xf32> -> vector<16x96xf32>
    %c160 = arith.constant 160 : index
    %c0_7 = arith.constant 0 : index
    %5 = vector.load %arg2[%c160, %c0_7] : memref<168x96xf32, #tpu.memory_space<vmem>>, vector<1x96xf32>
    %6 = vector.broadcast %5 : vector<1x96xf32> to vector<16x96xf32>
    %7 = arith.addf %4, %6 : vector<16x96xf32>
    %8 = vector.shape_cast %1 : vector<2x1x8xf32> to vector<2x1x8xf32>
    %9 = vector.broadcast %8 : vector<2x1x8xf32> to vector<2x8x8xf32>
    %10 = vector.extract_strided_slice %7 {offsets = [0, 0], sizes = [16, 8], strides = [1, 1]} : vector<16x96xf32> to vector<16x8xf32>
    %11 = vector.shape_cast %10 : vector<16x8xf32> to vector<2x8x8xf32>
    %12 = vector.extract_strided_slice %7 {offsets = [0, 32], sizes = [16, 8], strides = [1, 1]} : vector<16x96xf32> to vector<16x8xf32>
    %13 = vector.shape_cast %12 : vector<16x8xf32> to vector<2x8x8xf32>
    %14 = vector.extract_strided_slice %7 {offsets = [0, 64], sizes = [16, 8], strides = [1, 1]} : vector<16x96xf32> to vector<16x8xf32>
    %15 = vector.shape_cast %14 : vector<16x8xf32> to vector<2x8x8xf32>
    "tpu.trace_start"() <{level = 10 : i32, message = "bqd,bkd->bqk"}> : () -> ()
    %cst_8 = arith.constant dense<0.000000e+00> : vector<2x8x8xf32>
    %16 = tpu.matmul %11, %13, %cst_8 {dimension_numbers = #tpu.dot_dimension_numbers<[2], [2], [1], [1], [0, 0, 0, 1, 1, 1], [0], [0]>} : vector<2x8x8xf32>, vector<2x8x8xf32>, vector<2x8x8xf32> -> vector<2x8x8xf32>
    "tpu.trace_stop"() : () -> ()
    %17 = arith.addf %16, %9 : vector<2x8x8xf32>
    %cst_9 = arith.constant dense<0xFF800000> : vector<2x8xf32>
    %18 = vector.multi_reduction <maximumf>, %17, %cst_9 [2] : vector<2x8x8xf32> to vector<2x8xf32>
    %19 = vector.shape_cast %18 : vector<2x8xf32> to vector<2x8x1xf32>
    %20 = vector.broadcast %19 : vector<2x8x1xf32> to vector<2x8x8xf32>
    %21 = arith.subf %17, %20 : vector<2x8x8xf32>
    %22 = math.exp %21 : vector<2x8x8xf32>
    %cst_10 = arith.constant dense<0.000000e+00> : vector<2x8xf32>
    %23 = vector.multi_reduction <add>, %22, %cst_10 [2] : vector<2x8x8xf32> to vector<2x8xf32>
    %24 = vector.shape_cast %23 : vector<2x8xf32> to vector<2x8x1xf32>
    %25 = tpu.reciprocal %24 {approx = true} : vector<2x8x1xf32> -> vector<2x8x1xf32>
    %26 = vector.broadcast %25 : vector<2x8x1xf32> to vector<2x8x8xf32>
    %27 = arith.mulf %22, %26 : vector<2x8x8xf32>
    "tpu.trace_start"() <{level = 10 : i32, message = "bqk,bkd->bqd"}> : () -> ()
    %cst_11 = arith.constant dense<0.000000e+00> : vector<2x8x8xf32>
    %28 = tpu.matmul %27, %15, %cst_11 {dimension_numbers = #tpu.dot_dimension_numbers<[2], [1], [1], [2], [0, 0, 0, 1, 1, 2], [0], [0]>} : vector<2x8x8xf32>, vector<2x8x8xf32>, vector<2x8x8xf32> -> vector<2x8x8xf32>
    "tpu.trace_stop"() : () -> ()
    %29 = vector.extract_strided_slice %7 {offsets = [0, 8], sizes = [16, 8], strides = [1, 1]} : vector<16x96xf32> to vector<16x8xf32>
    %30 = vector.shape_cast %29 : vector<16x8xf32> to vector<2x8x8xf32>
    %31 = vector.extract_strided_slice %7 {offsets = [0, 40], sizes = [16, 8], strides = [1, 1]} : vector<16x96xf32> to vector<16x8xf32>
    %32 = vector.shape_cast %31 : vector<16x8xf32> to vector<2x8x8xf32>
    %33 = vector.extract_strided_slice %7 {offsets = [0, 72], sizes = [16, 8], strides = [1, 1]} : vector<16x96xf32> to vector<16x8xf32>
    %34 = vector.shape_cast %33 : vector<16x8xf32> to vector<2x8x8xf32>
    "tpu.trace_start"() <{level = 10 : i32, message = "bqd,bkd->bqk"}> : () -> ()
    %cst_12 = arith.constant dense<0.000000e+00> : vector<2x8x8xf32>
    %35 = tpu.matmul %30, %32, %cst_12 {dimension_numbers = #tpu.dot_dimension_numbers<[2], [2], [1], [1], [0, 0, 0, 1, 1, 1], [0], [0]>} : vector<2x8x8xf32>, vector<2x8x8xf32>, vector<2x8x8xf32> -> vector<2x8x8xf32>
    "tpu.trace_stop"() : () -> ()
    %36 = arith.addf %35, %9 : vector<2x8x8xf32>
    %cst_13 = arith.constant dense<0xFF800000> : vector<2x8xf32>
    %37 = vector.multi_reduction <maximumf>, %36, %cst_13 [2] : vector<2x8x8xf32> to vector<2x8xf32>
    %38 = vector.shape_cast %37 : vector<2x8xf32> to vector<2x8x1xf32>
    %39 = vector.broadcast %38 : vector<2x8x1xf32> to vector<2x8x8xf32>
    %40 = arith.subf %36, %39 : vector<2x8x8xf32>
    %41 = math.exp %40 : vector<2x8x8xf32>
    %cst_14 = arith.constant dense<0.000000e+00> : vector<2x8xf32>
    %42 = vector.multi_reduction <add>, %41, %cst_14 [2] : vector<2x8x8xf32> to vector<2x8xf32>
    %43 = vector.shape_cast %42 : vector<2x8xf32> to vector<2x8x1xf32>
    %44 = tpu.reciprocal %43 {approx = true} : vector<2x8x1xf32> -> vector<2x8x1xf32>
    %45 = vector.broadcast %44 : vector<2x8x1xf32> to vector<2x8x8xf32>
    %46 = arith.mulf %41, %45 : vector<2x8x8xf32>
    "tpu.trace_start"() <{level = 10 : i32, message = "bqk,bkd->bqd"}> : () -> ()
    %cst_15 = arith.constant dense<0.000000e+00> : vector<2x8x8xf32>
    %47 = tpu.matmul %46, %34, %cst_15 {dimension_numbers = #tpu.dot_dimension_numbers<[2], [1], [1], [2], [0, 0, 0, 1, 1, 2], [0], [0]>} : vector<2x8x8xf32>, vector<2x8x8xf32>, vector<2x8x8xf32> -> vector<2x8x8xf32>
    "tpu.trace_stop"() : () -> ()
    %48 = vector.extract_strided_slice %7 {offsets = [0, 16], sizes = [16, 8], strides = [1, 1]} : vector<16x96xf32> to vector<16x8xf32>
    %49 = vector.shape_cast %48 : vector<16x8xf32> to vector<2x8x8xf32>
    %50 = vector.extract_strided_slice %7 {offsets = [0, 48], sizes = [16, 8], strides = [1, 1]} : vector<16x96xf32> to vector<16x8xf32>
    %51 = vector.shape_cast %50 : vector<16x8xf32> to vector<2x8x8xf32>
    %52 = vector.extract_strided_slice %7 {offsets = [0, 80], sizes = [16, 8], strides = [1, 1]} : vector<16x96xf32> to vector<16x8xf32>
    %53 = vector.shape_cast %52 : vector<16x8xf32> to vector<2x8x8xf32>
    "tpu.trace_start"() <{level = 10 : i32, message = "bqd,bkd->bqk"}> : () -> ()
    %cst_16 = arith.constant dense<0.000000e+00> : vector<2x8x8xf32>
    %54 = tpu.matmul %49, %51, %cst_16 {dimension_numbers = #tpu.dot_dimension_numbers<[2], [2], [1], [1], [0, 0, 0, 1, 1, 1], [0], [0]>} : vector<2x8x8xf32>, vector<2x8x8xf32>, vector<2x8x8xf32> -> vector<2x8x8xf32>
    "tpu.trace_stop"() : () -> ()
    %55 = arith.addf %54, %9 : vector<2x8x8xf32>
    %cst_17 = arith.constant dense<0xFF800000> : vector<2x8xf32>
    %56 = vector.multi_reduction <maximumf>, %55, %cst_17 [2] : vector<2x8x8xf32> to vector<2x8xf32>
    %57 = vector.shape_cast %56 : vector<2x8xf32> to vector<2x8x1xf32>
    %58 = vector.broadcast %57 : vector<2x8x1xf32> to vector<2x8x8xf32>
    %59 = arith.subf %55, %58 : vector<2x8x8xf32>
    %60 = math.exp %59 : vector<2x8x8xf32>
    %cst_18 = arith.constant dense<0.000000e+00> : vector<2x8xf32>
    %61 = vector.multi_reduction <add>, %60, %cst_18 [2] : vector<2x8x8xf32> to vector<2x8xf32>
    %62 = vector.shape_cast %61 : vector<2x8xf32> to vector<2x8x1xf32>
    %63 = tpu.reciprocal %62 {approx = true} : vector<2x8x1xf32> -> vector<2x8x1xf32>
    %64 = vector.broadcast %63 : vector<2x8x1xf32> to vector<2x8x8xf32>
    %65 = arith.mulf %60, %64 : vector<2x8x8xf32>
    "tpu.trace_start"() <{level = 10 : i32, message = "bqk,bkd->bqd"}> : () -> ()
    %cst_19 = arith.constant dense<0.000000e+00> : vector<2x8x8xf32>
    %66 = tpu.matmul %65, %53, %cst_19 {dimension_numbers = #tpu.dot_dimension_numbers<[2], [1], [1], [2], [0, 0, 0, 1, 1, 2], [0], [0]>} : vector<2x8x8xf32>, vector<2x8x8xf32>, vector<2x8x8xf32> -> vector<2x8x8xf32>
    "tpu.trace_stop"() : () -> ()
    %67 = vector.extract_strided_slice %7 {offsets = [0, 24], sizes = [16, 8], strides = [1, 1]} : vector<16x96xf32> to vector<16x8xf32>
    %68 = vector.shape_cast %67 : vector<16x8xf32> to vector<2x8x8xf32>
    %69 = vector.extract_strided_slice %7 {offsets = [0, 56], sizes = [16, 8], strides = [1, 1]} : vector<16x96xf32> to vector<16x8xf32>
    %70 = vector.shape_cast %69 : vector<16x8xf32> to vector<2x8x8xf32>
    %71 = vector.extract_strided_slice %7 {offsets = [0, 88], sizes = [16, 8], strides = [1, 1]} : vector<16x96xf32> to vector<16x8xf32>
    %72 = vector.shape_cast %71 : vector<16x8xf32> to vector<2x8x8xf32>
    "tpu.trace_start"() <{level = 10 : i32, message = "bqd,bkd->bqk"}> : () -> ()
    %cst_20 = arith.constant dense<0.000000e+00> : vector<2x8x8xf32>
    %73 = tpu.matmul %68, %70, %cst_20 {dimension_numbers = #tpu.dot_dimension_numbers<[2], [2], [1], [1], [0, 0, 0, 1, 1, 1], [0], [0]>} : vector<2x8x8xf32>, vector<2x8x8xf32>, vector<2x8x8xf32> -> vector<2x8x8xf32>
    "tpu.trace_stop"() : () -> ()
    %74 = arith.addf %73, %9 : vector<2x8x8xf32>
    %cst_21 = arith.constant dense<0xFF800000> : vector<2x8xf32>
    %75 = vector.multi_reduction <maximumf>, %74, %cst_21 [2] : vector<2x8x8xf32> to vector<2x8xf32>
    %76 = vector.shape_cast %75 : vector<2x8xf32> to vector<2x8x1xf32>
    %77 = vector.broadcast %76 : vector<2x8x1xf32> to vector<2x8x8xf32>
    %78 = arith.subf %74, %77 : vector<2x8x8xf32>
    %79 = math.exp %78 : vector<2x8x8xf32>
    %cst_22 = arith.constant dense<0.000000e+00> : vector<2x8xf32>
    %80 = vector.multi_reduction <add>, %79, %cst_22 [2] : vector<2x8x8xf32> to vector<2x8xf32>
    %81 = vector.shape_cast %80 : vector<2x8xf32> to vector<2x8x1xf32>
    %82 = tpu.reciprocal %81 {approx = true} : vector<2x8x1xf32> -> vector<2x8x1xf32>
    %83 = vector.broadcast %82 : vector<2x8x1xf32> to vector<2x8x8xf32>
    %84 = arith.mulf %79, %83 : vector<2x8x8xf32>
    "tpu.trace_start"() <{level = 10 : i32, message = "bqk,bkd->bqd"}> : () -> ()
    %cst_23 = arith.constant dense<0.000000e+00> : vector<2x8x8xf32>
    %85 = tpu.matmul %84, %72, %cst_23 {dimension_numbers = #tpu.dot_dimension_numbers<[2], [1], [1], [2], [0, 0, 0, 1, 1, 2], [0], [0]>} : vector<2x8x8xf32>, vector<2x8x8xf32>, vector<2x8x8xf32> -> vector<2x8x8xf32>
    "tpu.trace_stop"() : () -> ()
    %86 = tpu.concatenate %28, %47, %66, %85 in 2 : vector<2x8x8xf32>, vector<2x8x8xf32>, vector<2x8x8xf32>, vector<2x8x8xf32> -> vector<2x8x32xf32>
    %87 = vector.shape_cast %86 : vector<2x8x32xf32> to vector<16x32xf32>
    %c32 = arith.constant 32 : index
    %c0_24 = arith.constant 0 : index
    %88 = vector.load %arg2[%c32, %c0_24] : memref<168x96xf32, #tpu.memory_space<vmem>>, vector<32x32xf32>
    %cst_25 = arith.constant dense<0.000000e+00> : vector<16x32xf32>
    %89 = tpu.matmul %87, %88, %cst_25 {dimension_numbers = #tpu.dot_dimension_numbers<[1], [0], [0], [1], [0, 0, 1, 1], [], []>} : vector<16x32xf32>, vector<32x32xf32>, vector<16x32xf32> -> vector<16x32xf32>
    %c161 = arith.constant 161 : index
    %c0_26 = arith.constant 0 : index
    %90 = vector.load %arg2[%c161, %c0_26] : memref<168x96xf32, #tpu.memory_space<vmem>>, vector<1x32xf32>
    %91 = vector.broadcast %90 : vector<1x32xf32> to vector<16x32xf32>
    %92 = arith.addf %89, %91 : vector<16x32xf32>
    %93 = arith.addf %2, %92 : vector<16x32xf32>
    %c164 = arith.constant 164 : index
    %c0_27 = arith.constant 0 : index
    %94 = vector.load %arg2[%c164, %c0_27] : memref<168x96xf32, #tpu.memory_space<vmem>>, vector<1x32xf32>
    %c165 = arith.constant 165 : index
    %c0_28 = arith.constant 0 : index
    %95 = vector.load %arg2[%c165, %c0_28] : memref<168x96xf32, #tpu.memory_space<vmem>>, vector<1x32xf32>
    %cst_29 = arith.constant dense<0.000000e+00> : vector<16xf32>
    %96 = vector.multi_reduction <add>, %93, %cst_29 [1] : vector<16x32xf32> to vector<16xf32>
    %97 = vector.shape_cast %96 : vector<16xf32> to vector<16x1xf32>
    %cst_30 = arith.constant 3.200000e+01 : f32
    %98 = vector.broadcast %cst_30 : f32 to vector<16x1xf32>
    %99 = arith.divf %97, %98 : vector<16x1xf32>
    %100 = vector.broadcast %99 : vector<16x1xf32> to vector<16x32xf32>
    %101 = arith.subf %93, %100 : vector<16x32xf32>
    %102 = arith.mulf %101, %101 : vector<16x32xf32>
    %cst_31 = arith.constant dense<0.000000e+00> : vector<16xf32>
    %103 = vector.multi_reduction <add>, %102, %cst_31 [1] : vector<16x32xf32> to vector<16xf32>
    %104 = vector.shape_cast %103 : vector<16xf32> to vector<16x1xf32>
    %cst_32 = arith.constant 3.200000e+01 : f32
    %105 = vector.broadcast %cst_32 : f32 to vector<16x1xf32>
    %106 = arith.divf %104, %105 : vector<16x1xf32>
    %107 = vector.broadcast %99 : vector<16x1xf32> to vector<16x32xf32>
    %108 = arith.subf %93, %107 : vector<16x32xf32>
    %109 = vector.broadcast %94 : vector<1x32xf32> to vector<16x32xf32>
    %110 = arith.mulf %109, %108 : vector<16x32xf32>
    %cst_33 = arith.constant 9.99999974E-6 : f32
    %111 = vector.broadcast %cst_33 : f32 to vector<16x1xf32>
    %112 = arith.addf %106, %111 : vector<16x1xf32>
    %113 = math.rsqrt %112 : vector<16x1xf32>
    %114 = vector.broadcast %113 : vector<16x1xf32> to vector<16x32xf32>
    %115 = arith.mulf %110, %114 : vector<16x32xf32>
    %116 = vector.broadcast %95 : vector<1x32xf32> to vector<16x32xf32>
    %117 = arith.addf %115, %116 : vector<16x32xf32>
    %c64 = arith.constant 64 : index
    %c0_34 = arith.constant 0 : index
    %118 = vector.load %arg2[%c64, %c0_34] : memref<168x96xf32, #tpu.memory_space<vmem>>, vector<32x64xf32>
    %c96 = arith.constant 96 : index
    %c0_35 = arith.constant 0 : index
    %119 = vector.load %arg2[%c96, %c0_35] : memref<168x96xf32, #tpu.memory_space<vmem>>, vector<64x32xf32>
    %cst_36 = arith.constant dense<0.000000e+00> : vector<16x64xf32>
    %120 = tpu.matmul %117, %118, %cst_36 {dimension_numbers = #tpu.dot_dimension_numbers<[1], [0], [0], [1], [0, 0, 1, 1], [], []>} : vector<16x32xf32>, vector<32x64xf32>, vector<16x64xf32> -> vector<16x64xf32>
    %c162 = arith.constant 162 : index
    %c0_37 = arith.constant 0 : index
    %121 = vector.load %arg2[%c162, %c0_37] : memref<168x96xf32, #tpu.memory_space<vmem>>, vector<1x64xf32>
    %122 = vector.broadcast %121 : vector<1x64xf32> to vector<16x64xf32>
    %123 = arith.addf %120, %122 : vector<16x64xf32>
    %cst_38 = arith.constant 0.000000e+00 : f32
    %124 = vector.broadcast %cst_38 : f32 to vector<16x64xf32>
    %125 = arith.maximumf %123, %124 : vector<16x64xf32>
    %cst_39 = arith.constant dense<0.000000e+00> : vector<16x32xf32>
    %126 = tpu.matmul %125, %119, %cst_39 {dimension_numbers = #tpu.dot_dimension_numbers<[1], [0], [0], [1], [0, 0, 1, 1], [], []>} : vector<16x64xf32>, vector<64x32xf32>, vector<16x32xf32> -> vector<16x32xf32>
    %c163 = arith.constant 163 : index
    %c0_40 = arith.constant 0 : index
    %127 = vector.load %arg2[%c163, %c0_40] : memref<168x96xf32, #tpu.memory_space<vmem>>, vector<1x32xf32>
    %128 = vector.broadcast %127 : vector<1x32xf32> to vector<16x32xf32>
    %129 = arith.addf %126, %128 : vector<16x32xf32>
    %130 = arith.addf %117, %129 : vector<16x32xf32>
    %c166 = arith.constant 166 : index
    %c0_41 = arith.constant 0 : index
    %131 = vector.load %arg2[%c166, %c0_41] : memref<168x96xf32, #tpu.memory_space<vmem>>, vector<1x32xf32>
    %c167 = arith.constant 167 : index
    %c0_42 = arith.constant 0 : index
    %132 = vector.load %arg2[%c167, %c0_42] : memref<168x96xf32, #tpu.memory_space<vmem>>, vector<1x32xf32>
    %cst_43 = arith.constant dense<0.000000e+00> : vector<16xf32>
    %133 = vector.multi_reduction <add>, %130, %cst_43 [1] : vector<16x32xf32> to vector<16xf32>
    %134 = vector.shape_cast %133 : vector<16xf32> to vector<16x1xf32>
    %cst_44 = arith.constant 3.200000e+01 : f32
    %135 = vector.broadcast %cst_44 : f32 to vector<16x1xf32>
    %136 = arith.divf %134, %135 : vector<16x1xf32>
    %137 = vector.broadcast %136 : vector<16x1xf32> to vector<16x32xf32>
    %138 = arith.subf %130, %137 : vector<16x32xf32>
    %139 = arith.mulf %138, %138 : vector<16x32xf32>
    %cst_45 = arith.constant dense<0.000000e+00> : vector<16xf32>
    %140 = vector.multi_reduction <add>, %139, %cst_45 [1] : vector<16x32xf32> to vector<16xf32>
    %141 = vector.shape_cast %140 : vector<16xf32> to vector<16x1xf32>
    %cst_46 = arith.constant 3.200000e+01 : f32
    %142 = vector.broadcast %cst_46 : f32 to vector<16x1xf32>
    %143 = arith.divf %141, %142 : vector<16x1xf32>
    %144 = vector.broadcast %136 : vector<16x1xf32> to vector<16x32xf32>
    %145 = arith.subf %130, %144 : vector<16x32xf32>
    %146 = vector.broadcast %131 : vector<1x32xf32> to vector<16x32xf32>
    %147 = arith.mulf %146, %145 : vector<16x32xf32>
    %cst_47 = arith.constant 9.99999974E-6 : f32
    %148 = vector.broadcast %cst_47 : f32 to vector<16x1xf32>
    %149 = arith.addf %143, %148 : vector<16x1xf32>
    %150 = math.rsqrt %149 : vector<16x1xf32>
    %151 = vector.broadcast %150 : vector<16x1xf32> to vector<16x32xf32>
    %152 = arith.mulf %147, %151 : vector<16x32xf32>
    %153 = vector.broadcast %132 : vector<1x32xf32> to vector<16x32xf32>
    %154 = arith.addf %152, %153 : vector<16x32xf32>
    %155 = vector.shape_cast %154 : vector<16x32xf32> to vector<2x8x32xf32>
    %c0_48 = arith.constant 0 : index
    %c0_49 = arith.constant 0 : index
    %c0_50 = arith.constant 0 : index
    %156 = vector.load %arg3[%c0_48, %c0_49, %c0_50] : memref<2x8x32xf32, #tpu.memory_space<vmem>>, vector<2x8x32xf32>
    tpu.vector_store %arg3[%c0_48, %c0_49, %c0_50], %155 {strides = array<i32>} : memref<2x8x32xf32, #tpu.memory_space<vmem>>, vector<2x8x32xf32>,
    return
  }
}

</mosaic_0001>

<bundles_post_ra>
// kernel: encoder_layer_forward.1
= control target key start
LH: loop header
LB: loop body
LE: loop exit
PB: predicated region body
PF: predicated region fallthrough
CT: control target
= control target key end

     0   :  { %8 = vsyncpa [#allocation3], 0  ;;  %s2548_s0 = inlined_call_operand.hbm [shape: f32[2,8,32], index: 0, kind: input, shape index: {}]   ;;  %s2549_s1 = inlined_call_operand.vmem [shape: f32[2,1,8], index: 1, kind: input, shape index: {}]   ;;  %s2550_s2 = inlined_call_operand.hbm [shape: f32[168,96], index: 2, kind: input, shape index: {}]   ;;  %s2551_s3 = inlined_call_operand.hbm [shape: f32[2,8,32], index: 3, kind: output, shape index: {}]  }
   0x1   :  { %9 = vsyncpa [#allocation6], 0 }
   0x2   :  { %10 = vsyncpa [#allocation4], 0  ;;  %s2289_s12 = smov [#allocation2]   ;;  %s2217_s16 = scalar_lea.hbm %s2548_s0, 256 }
   0x3   :  { %s16_s13 = sshll.u32 %s2289_s12, 4  ;;  %p2218_p0 = scmp.ne.s32.totalorder %s2548_s0, %s2217_s16  ;;  %s17_s13 = int_to_ptr.vmem [resolvable:$true] %s16_s13 }
   0x4   :  { %p2221_p1 = scmp.lt.u32.totalorder %s2217_s16, %s2548_s0 }
   0x6   :  { %p2223_p2 = pnand %p2221_p1, %p2218_p0 }
   0x8   :  { %2226 = shalt.err (!%p2223_p2)
}
   0x9   :  { %s2227_s21 = scalar_lea.vmem %s17_s13, 256  ;;  %p2232_p4 = scmp.lt.s32.totalorder %s17_s13, %s17_s13 }
   0xa   :  { %p2228_p3 = scmp.ne.s32.totalorder %s17_s13, %s2227_s21  ;;  %p2233_p5 = scmp.lt.s32.totalorder %s2227_s21, %s2227_s21 }
   0xc   :  { %p2234_p6 = por %p2233_p5, %p2232_p4 }
   0xe   :  { %p2235_p7 = pnand %p2234_p6, %p2228_p3 }
  0x10   :  { %2238 = shalt.err (!%p2235_p7)
}
  0x11   :  { %s2290_s22 = smov 128   ;;  %s2291_s23 = smov 8  }
  0x12   :  { %22 = dma.hbm_to_vmem [thread:$0]  %s2548_s0, 256, %s17_s13, [#allocation3], %s2290_s22, %s2290_s22, %s2291_s23  }
  0x13   :  { %s2292_s26 = smov [#allocation5]   ;;  %s2239_s30 = scalar_lea.hbm %s2550_s2, 2688 }
  0x14   :  { %s30_s27 = sshll.u32 %s2292_s26, 4  ;;  %p2240_p8 = scmp.ne.s32.totalorder %s2550_s2, %s2239_s30  ;;  %s31_s27 = int_to_ptr.vmem [resolvable:$true] %s30_s27 }
  0x15   :  { %p2243_p9 = scmp.lt.u32.totalorder %s2239_s30, %s2550_s2 }
  0x17   :  { %p2245_p10 = pnand %p2243_p9, %p2240_p8 }
  0x19   :  { %2248 = shalt.err (!%p2245_p10)
}
  0x1a   :  { %s2249_s8 = scalar_lea.vmem %s31_s27, 2688  ;;  %p2254_p12 = scmp.lt.s32.totalorder %s31_s27, %s31_s27 }
  0x1b   :  { %p2250_p11 = scmp.ne.s32.totalorder %s31_s27, %s2249_s8  ;;  %p2255_p13 = scmp.lt.s32.totalorder %s2249_s8, %s2249_s8 }
  0x1d   :  { %p2256_p0 = por %p2255_p13, %p2254_p12 }
  0x1f   :  { %p2257_p1 = pnand %p2256_p0, %p2250_p11 }
  0x21   :  { %2260 = shalt.err (!%p2257_p1)
}
  0x22   :  { %36 = dma.hbm_to_vmem [thread:$0]  %s2550_s2, 2688, %s31_s27, [#allocation6], %s2290_s22, %s2290_s22, %s2291_s23  }
  0x23   :  { %2283 = dma.done.wait [#allocation3], 256  }
  0x24   :  { %2284 = vsyncadd [#allocation3], 4294967040 }
  0x25   :  { %2285 = dma.done.wait [#allocation6], 2688  }
  0x26   :  { %2286 = vsyncadd [#allocation6], 4294964608  ;;  %vm56_vm0 = vcmask 261120   ;;  %v47_v0 = vld [vmem:[#allocation5] sm:$0xff]  ;;  %v48_v1 = vld [vmem:[#allocation5 + $0x8] sm:$0xff]  ;;  %v2293_v8 = vmov 0.0  }
  0x27   :  { %v49_v2 = vld [vmem:[#allocation5 + $0x10] sm:$0xff]  ;;  %v2117_v3 = vpack.c.bf16 %v48_v1, %v47_v0  ;;  %v50_v4 = vld [vmem:[#allocation5 + $0x18] sm:$0xff]  ;;  %2006 = vmatprep.subr.mxu0 %v2293_v8  ;;  %vm2294_vm1 = vmmov 0   ;;  %v1883_v9 = vld [vmem:[#allocation5 + $0xa0] ss:$0 sm:$0xff]  ;;  %s2295_s2 = smov 96  }
  0x28   :  { %v2359_v5 = vld [vmem:[#allocation2] sm:$0xff]  ;;  %v2121_v6 = vpack.c.bf16 %v50_v4, %v49_v2  ;;  %v2363_v7 = vld [vmem:[#allocation2 + $0x8] sm:$0xff]  ;;  %2008 = vmatprep.mubr.msk.f32.mxu0 %vm2294_vm1, %v2293_v8  ;;  %vm153_vm2 = vcmask 64512   ;;  %s2296_s14 = smov 64   ;;  %s2297_s15 = smov 88   ;;  %vm1498_vm3 = vcmask 195584  }
  0x29   :  { %1993 = vmatprep.mubr.msk.f32.mxu1 %vm56_vm0, %v2359_v5  ;;  %2118 = vmatprep.subr.bf16.mxu1 %v2117_v3  ;;  %v2394_v16 = vld [vmem:[%s2549_s1] ss:$0 sm:$0xff]  ;;  %v2400_v20 = vld [vmem:[%s2549_s1 + $0x1] ss:$0 sm:$0xff]  ;;  %s2298_s1 = smov 120   ;;  %s2299_s16 = smov 56  }
  0x2a   :  { %2120 = vmatpush3.bf16.msra.mxu1 %v2117_v3  ;;  %s2300_s17 = smov 80   ;;  %s2301_s18 = smov 112   ;;  %vm1495_vm4 = vcmask 130048   ;;  %vm1739_vm5 = vcmask 523264  }
  0x2b   :  { %2122 = vmatprep.subr.bf16.mxu1 %v2121_v6  ;;  %s2302_s19 = smov 48   ;;  %s2303_s20 = smov 72  }
  0x2c   :  { %s2304_s21 = smov 104   ;;  %s2305_s24 = smov 40  }
  0x2d   :  { %s2306_s25 = smov 16   ;;  %s2307_s26 = smov 24  }
  0x2e   :  { %2124 = vmatpush3.bf16.msra.mxu1 %v2121_v6  ;;  %s2308_s27 = smov [#allocation7]  }
  0x2f   :  { %1996 = vmatprep.subr.mxu1 %v2293_v8  ;;  %s1870_s28 = sshll.u32 %s2308_s27, 4  ;;  %s1871_s28 = int_to_ptr.vmem [resolvable:$true] %s1870_s28 }
  0x30   :  { %s2261_s29 = scalar_lea.vmem %s1871_s28, 256  ;;  %p2266_p3 = scmp.lt.s32.totalorder %s1871_s28, %s1871_s28 }
  0x31   :  { %1994 = vmatmul.mubr.msk.f32.vlgmr.msra.gmra.mrb[0].mxu1 %vm56_vm0, %v2363_v7  ;;  %p2262_p2 = scmp.ne.s32.totalorder %s1871_s28, %s2261_s29  ;;  %p2267_p4 = scmp.lt.s32.totalorder %s2261_s29, %s2261_s29 }
  0x32   :  { %1998 = vmatprep.mubr.msk.f32.mxu1 %vm2294_vm1, %v2293_v8 }
  0x33   :  { %p2268_p5 = por %p2267_p4, %p2266_p3 }
  0x35   :  { %p2269_p6 = pnand %p2268_p5, %p2262_p2 }
 0x104   :  { %v1995_v10 = vpop.f32.mrb[0].mxu1 }
 0x105   :  { %v129_v11 = vpop.f32.mrb[1].mxu1  ;;  %v2376_v13 = vadd.f32 %v1995_v10, %v1883_v9 }
 0x106   :  { %v2373_v12 = vadd.f32 %v1883_v9, %v129_v11 }
 0x108   :  { %151 = vrot.lane.b32.xlu0 %v2373_v12, %s2295_s2 }
 0x10c   :  { %229 = vrot.lane.b32.xlu0 %v2376_v13, %s2295_s2 }
 0x17a   :  { %v152_v14 = vpop.permute.xlu0 %151 }
 0x17b   :  { %1997 = vmatpush3.xpose.msk.msra.mxu1 %vm153_vm2, %v152_v14 }
 0x17c   :  { %2001 = vmatprep.subr.mxu1 %v2293_v8 }
 0x17e   :  { %1999 = vmatmul.mubr.msk.f32.vlgmr.msra.gmra.mrb[2].mxu1 %vm153_vm2, %v2373_v12  ;;  %v230_v15 = vpop.permute.xlu0 %229 }
 0x17f   :  { %2002 = vmatpush3.xpose.msk.msra.mxu1 %vm153_vm2, %v230_v15  ;;  %2003 = vmatprep.mubr.msk.f32.mxu1 %vm2294_vm1, %v2293_v8 }
 0x180   :  { %2011 = vmatprep.subr.mxu1 %v2293_v8 }
 0x182   :  { %2004 = vmatmul.mubr.msk.f32.vlgmr.msra.gmra.mrb[4].mxu1 %vm153_vm2, %v2376_v13 }
 0x183   :  { %2013 = vmatprep.mubr.msk.f32.mxu1 %vm2294_vm1, %v2293_v8 }
 0x251   :  { %v224_v17 = vpop.f32.mrb[2].mxu1 }
 0x252   :  { %v225_v18 = vadd.f32 %v2394_v16, %v224_v17  ;;  %v2000_v19 = vpop.f32.mrb[3].mxu1 }
 0x254   :  { %v305_v21 = vsel %vm153_vm2, %v225_v18, -inf }
 0x255   :  { %306 = vmax.xlane.f32.xlu1 %v305_v21  ;;  %v301_v22 = vpop.f32.mrb[4].mxu1 }
 0x256   :  { %v302_v23 = vadd.f32 %v2400_v20, %v301_v22  ;;  %v2005_v24 = vpop.f32.mrb[5].mxu1 }
 0x258   :  { %v308_v25 = vsel %vm153_vm2, %v302_v23, -inf }
 0x259   :  { %309 = vmax.xlane.f32.xlu1 %v308_v25 }
 0x26a   :  { %327 = vrot.lane.b32.xlu1 %v2373_v12, %s2296_s14 }
 0x26e   :  { %403 = vrot.lane.b32.xlu1 %v2376_v13, %s2296_s14 }
 0x272   :  { %481 = vrot.lane.b32.xlu1 %v2373_v12, %s2297_s15 }
 0x276   :  { %559 = vrot.lane.b32.xlu1 %v2376_v13, %s2297_s15 }
 0x2e2   :  { %v307_v26 = vpop.xlane.xlu1 %306 }
 0x2e3   :  { %v311_v27 = vsub.f32 %v225_v18, %v307_v26 }
 0x2e5   :  { %v313_v28 = vmul.f32 1.442695, %v311_v27 }
 0x2e6   :  { %v310_v29 = vpop.xlane.xlu1 %309 }
 0x2e7   :  { %2177 = vpow2.f32 %v313_v28  ;;  %v312_v30 = vsub.f32 %v302_v23, %v310_v29 }
 0x2e9   :  { %v315_v31 = vmul.f32 1.442695, %v312_v30 }
 0x2ea   :  { %v328_v32 = vpop.permute.xlu1 %327 }
 0x2eb   :  { %2179 = vpow2.f32 %v315_v31  ;;  %2007 = vmatpush3.msra.mxu0 %v328_v32 }
 0x2ec   :  { %2016 = vmatprep.subr.mxu0 %v2293_v8 }
 0x2ee   :  { %v404_v33 = vpop.permute.xlu1 %403 }
 0x2ef   :  { %2012 = vmatpush3.msra.mxu1 %v404_v33 }
 0x2f0   :  { %2021 = vmatprep.subr.mxu1 %v2293_v8 }
 0x2f1   :  { %v2178_v34 = vpop.eup %2177 }
 0x2f2   :  { %v317_v35 = vsel %vm153_vm2, %v2178_v34, 0.0  ;;  %v482_v38 = vpop.permute.xlu1 %481 }
 0x2f3   :  { %318 = vadd.xlane.f32.xlu0 %v317_v35 }
 0x2f5   :  { %v2180_v36 = vpop.eup %2179 }
 0x2f6   :  { %v320_v37 = vsel %vm153_vm2, %v2180_v36, 0.0  ;;  %v560_v39 = vpop.permute.xlu1 %559 }
 0x2f7   :  { %321 = vadd.xlane.f32.xlu1 %v320_v37 }
 0x308   :  { %557 = vrot.lane.b32.xlu1 %v2376_v13, %s2298_s1 }
 0x309   :  { %479 = vrot.lane.b32.xlu0 %v2373_v12, %s2298_s1 }
 0x380   :  { %v319_v40 = vpop.xlane.xlu0 %318 }
 0x381   :  { %2181 = vrcp.f32 %v319_v40 }
 0x384   :  { %v322_v41 = vpop.xlane.xlu1 %321  ;;  %v480_v46 = vpop.permute.xlu0 %479 }
 0x385   :  { %2183 = vrcp.f32 %v322_v41 }
 0x388   :  { %v558_v47 = vpop.permute.xlu1 %557 }
 0x38b   :  { %v2182_v42 = vpop.eup %2181 }
 0x38c   :  { %v325_v43 = vmul.f32 %v2182_v42, %v2178_v34 }
 0x38e   :  { %2009 = vmatmul.mubr.msk.f32.vlgmr.msra.gmra.mrb[0].mxu0 %vm153_vm2, %v325_v43 }
 0x38f   :  { %v2184_v44 = vpop.eup %2183  ;;  %2017 = vmatpush3.xpose.msk.msra.mxu0 %vm153_vm2, %v482_v38  ;;  %2018 = vmatprep.mubr.msk.f32.mxu0 %vm2294_vm1, %v2293_v8 }
 0x390   :  { %v326_v45 = vmul.f32 %v2184_v44, %v2180_v36  ;;  %2026 = vmatprep.subr.mxu0 %v2293_v8 }
 0x392   :  { %2014 = vmatmul.mubr.msk.f32.vlgmr.msra.gmra.mrb[6].mxu1 %vm153_vm2, %v326_v45  ;;  %2019 = vmatmul.mubr.msk.f32.vlgmr.msra.gmra.mrb[2].mxu0 %vm153_vm2, %v480_v46 }
 0x393   :  { %2022 = vmatpush3.xpose.msk.msra.mxu1 %vm153_vm2, %v560_v39  ;;  %2023 = vmatprep.mubr.msk.f32.mxu1 %vm2294_vm1, %v2293_v8 }
 0x394   :  { %2031 = vmatprep.subr.mxu1 %v2293_v8  ;;  %2028 = vmatprep.mubr.msk.f32.mxu0 %vm2294_vm1, %v2293_v8 }
 0x396   :  { %2024 = vmatmul.mubr.msk.f32.vlgmr.msra.gmra.mrb[8].mxu1 %vm153_vm2, %v558_v47 }
 0x397   :  { %2033 = vmatprep.mubr.msk.f32.mxu1 %vm2294_vm1, %v2293_v8 }
 0x461   :  { %v2431_v48 = vpop.f32.mrb[0].mxu0 }
 0x462   :  { %v2010_v49 = vpop.f32.mrb[1].mxu0 }
 0x465   :  { %v2433_v50 = vpop.f32.mrb[6].mxu1  ;;  %v553_v51 = vpop.f32.mrb[2].mxu0 }
 0x466   :  { %v554_v52 = vadd.f32 %v2394_v16, %v553_v51  ;;  %v2015_v53 = vpop.f32.mrb[7].mxu1  ;;  %v2020_v54 = vpop.f32.mrb[3].mxu0 }
 0x468   :  { %v635_v55 = vsel %vm153_vm2, %v554_v52, -inf }
 0x469   :  { %v631_v56 = vpop.f32.mrb[8].mxu1  ;;  %636 = vmax.xlane.f32.xlu1 %v635_v55 }
 0x46a   :  { %v632_v57 = vadd.f32 %v2400_v20, %v631_v56  ;;  %v2025_v58 = vpop.f32.mrb[9].mxu1 }
 0x46c   :  { %v638_v59 = vsel %vm153_vm2, %v632_v57, -inf }
 0x46d   :  { %639 = vmax.xlane.f32.xlu0 %v638_v59 }
 0x47a   :  { %657 = vrot.lane.b32.xlu1 %v2373_v12, %s2299_s16 }
 0x47e   :  { %811 = vrot.lane.b32.xlu1 %v2373_v12, %s2300_s17 }
 0x482   :  { %889 = vrot.lane.b32.xlu1 %v2376_v13, %s2300_s17 }
 0x483   :  { %733 = vrot.lane.b32.xlu0 %v2376_v13, %s2299_s16 }
 0x487   :  { %809 = vrot.lane.b32.xlu0 %v2373_v12, %s2301_s18 }
 0x4f6   :  { %v637_v60 = vpop.xlane.xlu1 %636 }
 0x4f7   :  { %v641_v61 = vsub.f32 %v554_v52, %v637_v60 }
 0x4f9   :  { %v643_v62 = vmul.f32 1.442695, %v641_v61 }
 0x4fa   :  { %v658_v63 = vpop.permute.xlu1 %657  ;;  %v640_v0 = vpop.xlane.xlu0 %639 }
 0x4fb   :  { %2185 = vpow2.f32 %v643_v62  ;;  %v642_v1 = vsub.f32 %v632_v57, %v640_v0  ;;  %2027 = vmatpush3.msra.mxu0 %v658_v63 }
 0x4fc   :  { %2036 = vmatprep.subr.mxu0 %v2293_v8 }
 0x4fd   :  { %v645_v2 = vmul.f32 1.442695, %v642_v1 }
 0x4fe   :  { %v734_v3 = vpop.permute.xlu0 %733  ;;  %v812_v11 = vpop.permute.xlu1 %811 }
 0x4ff   :  { %2187 = vpow2.f32 %v645_v2  ;;  %2032 = vmatpush3.msra.mxu1 %v734_v3 }
 0x500   :  { %2041 = vmatprep.subr.mxu1 %v2293_v8 }
 0x502   :  { %v890_v14 = vpop.permute.xlu1 %889  ;;  %v810_v23 = vpop.permute.xlu0 %809 }
 0x505   :  { %v2186_v4 = vpop.eup %2185 }
 0x506   :  { %v647_v6 = vsel %vm153_vm2, %v2186_v4, 0.0 }
 0x507   :  { %648 = vadd.xlane.f32.xlu1 %v647_v6 }
 0x509   :  { %v2188_v9 = vpop.eup %2187 }
 0x50a   :  { %v650_v10 = vsel %vm153_vm2, %v2188_v9, 0.0 }
 0x50b   :  { %651 = vadd.xlane.f32.xlu1 %v650_v10 }
 0x51c   :  { %887 = vrot.lane.b32.xlu1 %v2376_v13, %s2301_s18 }
 0x594   :  { %v649_v15 = vpop.xlane.xlu1 %648 }
 0x595   :  { %2189 = vrcp.f32 %v649_v15 }
 0x598   :  { %v652_v17 = vpop.xlane.xlu1 %651 }
 0x599   :  { %2191 = vrcp.f32 %v652_v17 }
 0x59c   :  { %v888_v24 = vpop.permute.xlu1 %887 }
 0x59f   :  { %v2190_v18 = vpop.eup %2189 }
 0x5a0   :  { %v655_v19 = vmul.f32 %v2190_v18, %v2186_v4 }
 0x5a2   :  { %2029 = vmatmul.mubr.msk.f32.vlgmr.msra.gmra.mrb[4].mxu0 %vm153_vm2, %v655_v19 }
 0x5a3   :  { %v2192_v21 = vpop.eup %2191  ;;  %2037 = vmatpush3.xpose.msk.msra.mxu0 %vm153_vm2, %v812_v11  ;;  %2038 = vmatprep.mubr.msk.f32.mxu0 %vm2294_vm1, %v2293_v8 }
 0x5a4   :  { %v656_v22 = vmul.f32 %v2192_v21, %v2188_v9  ;;  %2046 = vmatprep.subr.mxu0 %v2293_v8 }
 0x5a6   :  { %2034 = vmatmul.mubr.msk.f32.vlgmr.msra.gmra.mrb[10].mxu1 %vm153_vm2, %v656_v22  ;;  %2039 = vmatmul.mubr.msk.f32.vlgmr.msra.gmra.mrb[6].mxu0 %vm153_vm2, %v810_v23 }
 0x5a7   :  { %2042 = vmatpush3.xpose.msk.msra.mxu1 %vm153_vm2, %v890_v14  ;;  %2043 = vmatprep.mubr.msk.f32.mxu1 %vm2294_vm1, %v2293_v8 }
 0x5a8   :  { %2051 = vmatprep.subr.mxu1 %v2293_v8  ;;  %2048 = vmatprep.mubr.msk.f32.mxu0 %vm2294_vm1, %v2293_v8 }
 0x5aa   :  { %2044 = vmatmul.mubr.msk.f32.vlgmr.msra.gmra.mrb[12].mxu1 %vm153_vm2, %v888_v24 }
 0x5ab   :  { %2053 = vmatprep.mubr.msk.f32.mxu1 %vm2294_vm1, %v2293_v8 }
 0x675   :  { %v2465_v25 = vpop.f32.mrb[4].mxu0 }
 0x676   :  { %v2030_v26 = vpop.f32.mrb[5].mxu0 }
 0x679   :  { %v2467_v27 = vpop.f32.mrb[10].mxu1  ;;  %v883_v28 = vpop.f32.mrb[6].mxu0 }
 0x67a   :  { %v884_v29 = vadd.f32 %v2394_v16, %v883_v28  ;;  %v2035_v30 = vpop.f32.mrb[11].mxu1  ;;  %v2040_v31 = vpop.f32.mrb[7].mxu0 }
 0x67b   :  { %v1501_v30 = vld [vmem:[#allocation5 + $0x20] sm:$0xff]  ;;  %v1502_v31 = vld [vmem:[#allocation5 + $0x28] sm:$0xff] }
 0x67c   :  { %v965_v32 = vsel %vm153_vm2, %v884_v29, -inf }
 0x67d   :  { %v961_v33 = vpop.f32.mrb[12].mxu1  ;;  %966 = vmax.xlane.f32.xlu0 %v965_v32  ;;  %v2125_v32 = vpack.c.bf16 %v1502_v31, %v1501_v30  ;;  %v1916_v31 = vld [vmem:[#allocation5 + $0xa5] ss:$0 sm:$0xff] }
 0x67e   :  { %v962_v34 = vadd.f32 %v2400_v20, %v961_v33  ;;  %v2045_v35 = vpop.f32.mrb[13].mxu1  ;;  %v1504_v33 = vld [vmem:[#allocation5 + $0x38] sm:$0xff] }
 0x680   :  { %v968_v36 = vsel %vm153_vm2, %v962_v34, -inf }
 0x681   :  { %969 = vmax.xlane.f32.xlu1 %v968_v36 }
 0x692   :  { %987 = vrot.lane.b32.xlu1 %v2373_v12, %s2302_s19 }
 0x693   :  { %1063 = vrot.lane.b32.xlu0 %v2376_v13, %s2302_s19 }
 0x696   :  { %1141 = vrot.lane.b32.xlu1 %v2373_v12, %s2303_s20 }
 0x69a   :  { %1219 = vrot.lane.b32.xlu1 %v2376_v13, %s2303_s20 }
 0x69e   :  { %1217 = vrot.lane.b32.xlu1 %v2376_v13, %s2304_s21 }
 0x70a   :  { %v967_v37 = vpop.xlane.xlu0 %966 }
 0x70b   :  { %v971_v38 = vsub.f32 %v884_v29, %v967_v37 }
 0x70d   :  { %v973_v39 = vmul.f32 1.442695, %v971_v38 }
 0x70e   :  { %v970_v40 = vpop.xlane.xlu1 %969  ;;  %v1064_v41 = vpop.permute.xlu0 %1063 }
 0x70f   :  { %2193 = vpow2.f32 %v973_v39  ;;  %v972_v42 = vsub.f32 %v962_v34, %v970_v40  ;;  %2052 = vmatpush3.msra.mxu1 %v1064_v41 }
 0x710   :  { %2061 = vmatprep.subr.mxu1 %v2293_v8 }
 0x711   :  { %v975_v43 = vmul.f32 1.442695, %v972_v42 }
 0x712   :  { %v988_v44 = vpop.permute.xlu1 %987 }
 0x713   :  { %2195 = vpow2.f32 %v975_v43  ;;  %2047 = vmatpush3.msra.mxu0 %v988_v44 }
 0x714   :  { %2056 = vmatprep.subr.mxu0 %v2293_v8 }
 0x716   :  { %v1142_v53 = vpop.permute.xlu1 %1141 }
 0x719   :  { %v2194_v45 = vpop.eup %2193 }
 0x71a   :  { %v977_v46 = vsel %vm153_vm2, %v2194_v45, 0.0  ;;  %v1220_v57 = vpop.permute.xlu1 %1219 }
 0x71b   :  { %978 = vadd.xlane.f32.xlu0 %v977_v46 }
 0x71d   :  { %v2196_v47 = vpop.eup %2195 }
 0x71e   :  { %v980_v49 = vsel %vm153_vm2, %v2196_v47, 0.0  ;;  %v1218_v60 = vpop.permute.xlu1 %1217 }
 0x71f   :  { %981 = vadd.xlane.f32.xlu0 %v980_v49 }
 0x735   :  { %1139 = vrot.lane.b32.xlu0 %v2373_v12, %s2304_s21 }
 0x7a8   :  { %v979_v51 = vpop.xlane.xlu0 %978 }
 0x7a9   :  { %2197 = vrcp.f32 %v979_v51 }
 0x7ac   :  { %v982_v52 = vpop.xlane.xlu0 %981 }
 0x7ad   :  { %2199 = vrcp.f32 %v982_v52 }
 0x7b0   :  { %v1140_v59 = vpop.permute.xlu0 %1139 }
 0x7b3   :  { %v2198_v54 = vpop.eup %2197 }
 0x7b4   :  { %v985_v55 = vmul.f32 %v2198_v54, %v2194_v45 }
 0x7b6   :  { %2049 = vmatmul.mubr.msk.f32.vlgmr.msra.gmra.mrb[8].mxu0 %vm153_vm2, %v985_v55 }
 0x7b7   :  { %v2200_v56 = vpop.eup %2199  ;;  %2057 = vmatpush3.xpose.msk.msra.mxu0 %vm153_vm2, %v1142_v53  ;;  %2058 = vmatprep.mubr.msk.f32.mxu0 %vm2294_vm1, %v2293_v8  ;;  %v1912_v53 = vld [vmem:[#allocation5 + $0xa1] ss:$0 sm:$0xff] }
 0x7b8   :  { %v986_v58 = vmul.f32 %v2200_v56, %v2196_v47  ;;  %2066 = vmatprep.subr.mxu0 %v2293_v8 }
 0x7ba   :  { %2054 = vmatmul.mubr.msk.f32.vlgmr.msra.gmra.mrb[14].mxu1 %vm153_vm2, %v986_v58  ;;  %2059 = vmatmul.mubr.msk.f32.vlgmr.msra.gmra.mrb[10].mxu0 %vm153_vm2, %v1140_v59 }
 0x7bb   :  { %2062 = vmatpush3.xpose.msk.msra.mxu1 %vm153_vm2, %v1220_v57  ;;  %2063 = vmatprep.mubr.msk.f32.mxu1 %vm2294_vm1, %v2293_v8 }
 0x7bc   :  { %2071 = vmatprep.subr.mxu1 %v2293_v8  ;;  %2068 = vmatprep.mubr.msk.f32.mxu0 %vm2294_vm1, %v2293_v8 }
 0x7be   :  { %2064 = vmatmul.mubr.msk.f32.vlgmr.msra.gmra.mrb[16].mxu1 %vm153_vm2, %v1218_v60 }
 0x7bf   :  { %2073 = vmatprep.mubr.msk.f32.mxu1 %vm2294_vm1, %v2293_v8 }
 0x889   :  { %v1059_v61 = vpop.f32.mrb[8].mxu0 }
 0x88a   :  { %v2050_v62 = vpop.f32.mrb[9].mxu0 }
 0x88d   :  { %v1135_v63 = vpop.f32.mrb[14].mxu1  ;;  %v1213_v0 = vpop.f32.mrb[10].mxu0 }
 0x88e   :  { %v1214_v1 = vadd.f32 %v2394_v16, %v1213_v0  ;;  %v2055_v2 = vpop.f32.mrb[15].mxu1  ;;  %v2060_v3 = vpop.f32.mrb[11].mxu0 }
 0x890   :  { %v1295_v4 = vsel %vm153_vm2, %v1214_v1, -inf }
 0x891   :  { %v1291_v6 = vpop.f32.mrb[16].mxu1  ;;  %1296 = vmax.xlane.f32.xlu0 %v1295_v4 }
 0x892   :  { %v1292_v9 = vadd.f32 %v2400_v20, %v1291_v6  ;;  %v2065_v10 = vpop.f32.mrb[17].mxu1  ;;  %v1635_v6 = vld [vmem:[#allocation5 + $0x48] sm:$0xff] }
 0x894   :  { %v1298_v11 = vsel %vm153_vm2, %v1292_v9, -inf }
 0x895   :  { %1299 = vmax.xlane.f32.xlu1 %v1298_v11  ;;  %v1637_v11 = vld [vmem:[#allocation5 + $0x58] sm:$0xff] }
 0x8a6   :  { %1317 = vrot.lane.b32.xlu1 %v2373_v12, %s2305_s24 }
 0x8aa   :  { %1471 = vrot.lane.b32.xlu1 %v2465_v25, %s2291_s23 }
 0x8ae   :  { %1473 = vrot.lane.b32.xlu1 %v2467_v27, %s2291_s23 }
 0x8b2   :  { %1481 = vrot.lane.b32.xlu1 %v1135_v63, %s2306_s25 }
 0x91e   :  { %v1297_v8 = vpop.xlane.xlu0 %1296 }
 0x91f   :  { %v1301_v16 = vsub.f32 %v1214_v1, %v1297_v8 }
 0x921   :  { %v1303_v14 = vmul.f32 1.442695, %v1301_v16  ;;  %v1638_v16 = vld [vmem:[#allocation5 + $0x60] sm:$0xff] }
 0x922   :  { %v1300_v15 = vpop.xlane.xlu1 %1299 }
 0x923   :  { %2201 = vpow2.f32 %v1303_v14  ;;  %v1302_v20 = vsub.f32 %v1292_v9, %v1300_v15  ;;  %v1636_v9 = vld [vmem:[#allocation5 + $0x50] sm:$0xff]  ;;  %v1639_v14 = vld [vmem:[#allocation5 + $0x68] sm:$0xff] }
 0x924   :  { %v2137_v8 = vpack.c.bf16 %v1637_v11, %v1636_v9  ;;  %v1640_v15 = vld [vmem:[#allocation5 + $0x70] sm:$0xff]  ;;  %v1923_v9 = vld [vmem:[#allocation5 + $0xa6] ss:$0 sm:$0xff] }
 0x925   :  { %v1305_v17 = vmul.f32 1.442695, %v1302_v20  ;;  %v2141_v20 = vpack.c.bf16 %v1639_v14, %v1638_v16  ;;  %v1924_v16 = vld [vmem:[#allocation5 + $0xa7] ss:$0 sm:$0xff] }
 0x926   :  { %v1318_v18 = vpop.permute.xlu1 %1317 }
 0x927   :  { %2203 = vpow2.f32 %v1305_v17  ;;  %2067 = vmatpush3.msra.mxu0 %v1318_v18  ;;  %v1641_v17 = vld [vmem:[#allocation5 + $0x78] sm:$0xff] }
 0x928   :  { %2126 = vmatprep.subr.bf16.mxu0 %v2125_v32  ;;  %v2145_v18 = vpack.c.bf16 %v1641_v17, %v1640_v15 }
 0x92a   :  { %v1472_v39 = vpop.permute.xlu1 %1471 }
 0x92b   :  { %v1493_v42 = vsel %vm153_vm2, %v2431_v48, %v1472_v39 }
 0x92d   :  { %v2202_v19 = vpop.eup %2201 }
 0x92e   :  { %v1307_v12 = vsel %vm153_vm2, %v2202_v19, 0.0  ;;  %v1474_v40 = vpop.permute.xlu1 %1473 }
 0x92f   :  { %1308 = vadd.xlane.f32.xlu0 %v1307_v12  ;;  %v1494_v47 = vsel %vm153_vm2, %v2433_v50, %v1474_v40  ;;  %v1643_v12 = vld [vmem:[#allocation5 + $0x88] sm:$0xff]  ;;  %v1917_v40 = vld [vmem:[#allocation5 + $0xa2] ss:$0 sm:$0xff] }
 0x931   :  { %v2204_v21 = vpop.eup %2203 }
 0x932   :  { %v1310_v22 = vsel %vm153_vm2, %v2204_v21, 0.0  ;;  %v1482_v43 = vpop.permute.xlu1 %1481 }
 0x933   :  { %1311 = vadd.xlane.f32.xlu0 %v1310_v22  ;;  %v1497_v49 = vsel %vm1495_vm4, %v1494_v47, %v1482_v43  ;;  %v1920_v47 = vld [vmem:[#allocation5 + $0xa3] ss:$0 sm:$0xff] }
 0x949   :  { %1393 = vrot.lane.b32.xlu0 %v2376_v13, %s2305_s24  ;;  %v1503_v13 = vld [vmem:[#allocation5 + $0x30] sm:$0xff] }
 0x94a   :  { %v2129_v34 = vpack.c.bf16 %v1504_v33, %v1503_v13 }
 0x94d   :  { %1479 = vrot.lane.b32.xlu0 %v1059_v61, %s2306_s25 }
 0x9bc   :  { %v1309_v23 = vpop.xlane.xlu0 %1308 }
 0x9bd   :  { %2205 = vrcp.f32 %v1309_v23 }
 0x9c0   :  { %v1312_v24 = vpop.xlane.xlu0 %1311 }
 0x9c1   :  { %2207 = vrcp.f32 %v1312_v24 }
 0x9c4   :  { %v1394_v25 = vpop.permute.xlu0 %1393 }
 0x9c5   :  { %2072 = vmatpush3.msra.mxu1 %v1394_v25 }
 0x9c7   :  { %v2206_v26 = vpop.eup %2205 }
 0x9c8   :  { %v1315_v27 = vmul.f32 %v2206_v26, %v2202_v19  ;;  %v1480_v41 = vpop.permute.xlu0 %1479  ;;  %v1642_v19 = vld [vmem:[#allocation5 + $0x80] sm:$0xff] }
 0x9c9   :  { %v1496_v44 = vsel %vm1495_vm4, %v1493_v42, %v1480_v41 }
 0x9ca   :  { %2069 = vmatmul.mubr.msk.f32.vlgmr.msra.gmra.mrb[12].mxu0 %vm153_vm2, %v1315_v27 }
 0x9cb   :  { %v2208_v28 = vpop.eup %2207  ;;  %2128 = vmatpush3.bf16.msra.mxu0 %v2125_v32 }
 0x9cc   :  { %v1316_v29 = vmul.f32 %v2208_v28, %v2204_v21  ;;  %2130 = vmatprep.subr.bf16.mxu0 %v2129_v34  ;;  %v2149_v21 = vpack.c.bf16 %v1643_v12, %v1642_v19  ;;  %v1915_v28 = vld [vmem:[#allocation5 + $0xa4] ss:$0 sm:$0xff] }
 0x9ce   :  { %2074 = vmatmul.mubr.msk.f32.vlgmr.msra.gmra.mrb[18].mxu1 %vm153_vm2, %v1316_v29 }
 0x9cf   :  { %2132 = vmatpush3.bf16.msra.mxu0 %v2129_v34 }
 0x9d0   :  { %2142 = vmatprep.subr.bf16.mxu0 %v2141_v20 }
 0xa9d   :  { %v1389_v35 = vpop.f32.mrb[12].mxu0 }
 0xa9e   :  { %1487 = vrot.lane.b32.xlu0 %v1389_v35, %s2307_s26  ;;  %v2070_v36 = vpop.f32.mrb[13].mxu0 }
 0xaa1   :  { %v1465_v37 = vpop.f32.mrb[18].mxu1 }
 0xaa2   :  { %1489 = vrot.lane.b32.xlu1 %v1465_v37, %s2307_s26  ;;  %v2075_v38 = vpop.f32.mrb[19].mxu1  ;;  %v1644_v37 = vld [vmem:[#allocation5 + $0x90] sm:$0xff] }
 0xaa3   :  { %v1645_v38 = vld [vmem:[#allocation5 + $0x98] sm:$0xff] }
 0xaa4   :  { %v2153_v39 = vpack.c.bf16 %v1645_v38, %v1644_v37 }
 0xb10   :  { %v1488_v45 = vpop.permute.xlu0 %1487 }
 0xb11   :  { %v1499_v46 = vsel %vm1498_vm3, %v1496_v44, %v1488_v45 }
 0xb12   :  { %2084 = vmatprep.mubr.msk.f32.mxu0 %vm56_vm0, %v1499_v46 }
 0xb14   :  { %v1490_v51 = vpop.permute.xlu1 %1489 }
 0xb15   :  { %v1500_v52 = vsel %vm1498_vm3, %v1497_v49, %v1490_v51 }
 0xb16   :  { %2085 = vmatmul.mubr.msk.f32.vlgmr.msra.gmra.mrb[14].mxu0 %vm56_vm0, %v1500_v52 }
 0xb17   :  { %2144 = vmatpush3.bf16.msra.mxu0 %v2141_v20 }
 0xb18   :  { %2146 = vmatprep.subr.bf16.mxu0 %v2145_v18 }
 0xb1b   :  { %2148 = vmatpush3.bf16.msra.mxu0 %v2145_v18 }
 0xb1c   :  { %2150 = vmatprep.subr.bf16.mxu0 %v2149_v21 }
 0xb1f   :  { %2152 = vmatpush3.bf16.msra.mxu0 %v2149_v21 }
 0xb20   :  { %2154 = vmatprep.subr.bf16.mxu0 %v2153_v39 }
 0xb23   :  { %2156 = vmatpush3.bf16.msra.mxu0 %v2153_v39 }
 0xbe9   :  { %v2086_v54 = vpop.f32.mrb[14].mxu0 }
 0xbea   :  { %v1588_v55 = vadd.f32 %v2086_v54, %v1912_v53  ;;  %v1582_v56 = vpop.f32.mrb[15].mxu0 }
 0xbeb   :  { %v1583_v48 = vadd.f32 %v1912_v53, %v1582_v56 }
 0xbec   :  { %v1592_v57 = vadd.f32 %v1588_v55, %v2363_v7 }
 0xbed   :  { %v1591_v58 = vadd.f32 %v1583_v48, %v2359_v5  ;;  %v1634_v5 = vld [vmem:[#allocation5 + $0x40] sm:$0xff] }
 0xbee   :  { %v1598_v59 = vsel %vm56_vm0, %v1592_v57, 0.0  ;;  %v2133_v10 = vpack.c.bf16 %v1635_v6, %v1634_v5 }
 0xbef   :  { %1599 = vadd.xlane.f32.xlu1 %v1598_v59  ;;  %v1595_v60 = vsel %vm56_vm0, %v1591_v58, 0.0 }
 0xbf0   :  { %1596 = vadd.xlane.f32.xlu0 %v1595_v60  ;;  %2134 = vmatprep.subr.bf16.mxu1 %v2133_v10 }
 0xbf1   :  { %2136 = vmatpush3.bf16.msra.mxu1 %v2133_v10 }
 0xbf2   :  { %2138 = vmatprep.subr.bf16.mxu1 %v2137_v8 }
 0xbf5   :  { %2140 = vmatpush3.bf16.msra.mxu1 %v2137_v8 }
 0xc7c   :  { %v1600_v50 = vpop.xlane.xlu1 %1599 }
 0xc7d   :  { %v1603_v61 = vmul.f32 0.03125, %v1600_v50  ;;  %v1597_v62 = vpop.xlane.xlu0 %1596 }
 0xc7e   :  { %v1602_v63 = vmul.f32 0.03125, %v1597_v62 }
 0xc7f   :  { %v1605_v0 = vsub.f32 %v1592_v57, %v1603_v61 }
 0xc80   :  { %v1604_v1 = vsub.f32 %v1591_v58, %v1602_v63 }
 0xc81   :  { %v1607_v4 = vmul.f32 %v1605_v0, %v1605_v0  ;;  %v1621_v13 = vmul.f32 %v1915_v28, %v1605_v0 }
 0xc82   :  { %v1606_v2 = vmul.f32 %v1604_v1, %v1604_v1  ;;  %v1620_v29 = vmul.f32 %v1915_v28, %v1604_v1 }
 0xc83   :  { %v1611_v7 = vsel %vm56_vm0, %v1607_v4, 0.0 }
 0xc84   :  { %v1608_v3 = vsel %vm56_vm0, %v1606_v2, 0.0 }
 0xc85   :  { %1609 = vadd.xlane.f32.xlu0 %v1608_v3 }
 0xc89   :  { %1612 = vadd.xlane.f32.xlu0 %v1611_v7 }
 0xd12   :  { %v1610_v22 = vpop.xlane.xlu0 %1609 }
 0xd13   :  { %v1614_v23 = vmul.f32 0.03125, %v1610_v22 }
 0xd15   :  { %v1622_v24 = vadd.f32 1e-05, %v1614_v23 }
 0xd16   :  { %v1613_v25 = vpop.xlane.xlu0 %1612 }
 0xd17   :  { %2209 = vrsqrt.f32 %v1622_v24  ;;  %v1615_v26 = vmul.f32 0.03125, %v1613_v25 }
 0xd19   :  { %v1623_v27 = vadd.f32 1e-05, %v1615_v26 }
 0xd1b   :  { %2211 = vrsqrt.f32 %v1623_v27 }
 0xd21   :  { %v2210_v30 = vpop.eup %2209 }
 0xd22   :  { %v1626_v32 = vmul.f32 %v2210_v30, %v1620_v29 }
 0xd24   :  { %v1632_v33 = vadd.f32 %v1916_v31, %v1626_v32 }
 0xd25   :  { %v2212_v34 = vpop.eup %2211 }
 0xd26   :  { %v1627_v35 = vmul.f32 %v2212_v34, %v1621_v13  ;;  %2095 = vmatprep.mubr.msk.f32.mxu1 %vm56_vm0, %v1632_v33 }
 0xd28   :  { %v1633_v36 = vadd.f32 %v1916_v31, %v1627_v35 }
 0xd2a   :  { %2096 = vmatmul.mubr.msk.f32.vlgmr.msra.gmra.mrb[20].mxu1 %vm56_vm0, %v1633_v36 }
 0xdfd   :  { %v2097_v41 = vpop.f32.mrb[20].mxu1 }
 0xdfe   :  { %v1729_v42 = vadd.f32 %v2097_v41, %v1917_v40  ;;  %v1723_v43 = vpop.f32.mrb[21].mxu1 }
 0xdff   :  { %v1724_v44 = vadd.f32 %v1917_v40, %v1723_v43 }
 0xe00   :  { %v1733_v46 = vmax.f32 %v1729_v42, 0.0 }
 0xe01   :  { %v1732_v45 = vmax.f32 %v1724_v44, 0.0 }
 0xe03   :  { %2114 = vmatprep.mubr.msk.f32.mxu0 %vm1739_vm5, %v1732_v45 }
 0xe04   :  { %2115 = vmatmul.mubr.msk.f32.vlgmr.msra.gmra.mrb[16].mxu0 %vm1739_vm5, %v1733_v46 }
 0xed7   :  { %v2116_v49 = vpop.f32.mrb[16].mxu0 }
 0xed8   :  { %v1818_v51 = vadd.f32 %v2116_v49, %v1920_v47  ;;  %v1812_v52 = vpop.f32.mrb[17].mxu0 }
 0xed9   :  { %v1813_v53 = vadd.f32 %v1920_v47, %v1812_v52 }
 0xeda   :  { %v1822_v54 = vadd.f32 %v1818_v51, %v1633_v36 }
 0xedb   :  { %v1821_v55 = vadd.f32 %v1813_v53, %v1632_v33 }
 0xedc   :  { %v1828_v56 = vsel %vm56_vm0, %v1822_v54, 0.0 }
 0xedd   :  { %1829 = vadd.xlane.f32.xlu0 %v1828_v56  ;;  %v1825_v48 = vsel %vm56_vm0, %v1821_v55, 0.0 }
 0xede   :  { %1826 = vadd.xlane.f32.xlu1 %v1825_v48 }
 0xf6a   :  { %v1830_v57 = vpop.xlane.xlu0 %1829 }
 0xf6b   :  { %v1832_v58 = vmul.f32 0.03125, %v1830_v57  ;;  %v1827_v59 = vpop.xlane.xlu1 %1826 }
 0xf6c   :  { %v1831_v60 = vmul.f32 0.03125, %v1827_v59 }
 0xf6d   :  { %v1834_v50 = vsub.f32 %v1822_v54, %v1832_v58 }
 0xf6e   :  { %v1833_v61 = vsub.f32 %v1821_v55, %v1831_v60 }
 0xf6f   :  { %v1836_v62 = vmul.f32 %v1834_v50, %v1834_v50  ;;  %v1850_v10 = vmul.f32 %v1923_v9, %v1834_v50 }
 0xf70   :  { %v1835_v63 = vmul.f32 %v1833_v61, %v1833_v61  ;;  %v1849_v8 = vmul.f32 %v1923_v9, %v1833_v61 }
 0xf71   :  { %v1840_v0 = vsel %vm56_vm0, %v1836_v62, 0.0 }
 0xf72   :  { %1841 = vadd.xlane.f32.xlu0 %v1840_v0  ;;  %v1837_v1 = vsel %vm56_vm0, %v1835_v63, 0.0 }
 0xf73   :  { %1838 = vadd.xlane.f32.xlu1 %v1837_v1 }
 0xfff   :  { %v1842_v2 = vpop.xlane.xlu0 %1841 }
0x1000   :  { %v1844_v3 = vmul.f32 0.03125, %v1842_v2  ;;  %v1839_v4 = vpop.xlane.xlu1 %1838 }
0x1001   :  { %v1843_v7 = vmul.f32 0.03125, %v1839_v4 }
0x1002   :  { %v1852_v5 = vadd.f32 1e-05, %v1844_v3 }
0x1003   :  { %v1851_v6 = vadd.f32 1e-05, %v1843_v7 }
0x1004   :  { %2213 = vrsqrt.f32 %v1852_v5 }
0x1005   :  { %2215 = vrsqrt.f32 %v1851_v6 }
0x100e   :  { %v2214_v11 = vpop.eup %2213 }
0x100f   :  { %v2216_v14 = vpop.eup %2215  ;;  %v1856_v15 = vmul.f32 %v2214_v11, %v1850_v10 }
0x1010   :  { %v1855_v20 = vmul.f32 %v2216_v14, %v1849_v8 }
0x1011   :  { %v1862_v17 = vadd.f32 %v1924_v16, %v1856_v15 }
0x1012   :  { %v1861_v18 = vadd.f32 %v1924_v16, %v1855_v20 }
0x1013   :  { %1864 = vst.msk [vmem:[#allocation7 + $0x8] sm:$0xff] %vm56_vm0, %v1862_v17 }
0x1014   :  { %1863 = vst.msk [vmem:[#allocation7] sm:$0xff] %vm56_vm0, %v1861_v18 }
0x1015   :  { %2272 = shalt.err (!%p2269_p6)
}
0x1016   :  { %s2273_s5 = scalar_lea.hbm %s2551_s3, 256 }
0x1017   :  { %p2274_p7 = scmp.ne.s32.totalorder %s2551_s3, %s2273_s5  ;;  %p2277_p8 = scmp.lt.u32.totalorder %s2273_s5, %s2551_s3 }
0x1019   :  { %p2279_p9 = pnand %p2277_p8, %p2274_p7 }
0x101b   :  { %2282 = shalt.err (!%p2279_p9)
}
0x101c   :  { %1876 = dma.vmem_to_hbm [thread:$0]  %s1871_s28, 256, %s2551_s3, [#allocation4], %s2290_s22, %s2290_s22, %s2291_s23  }
0x101d   :  { %2287 = dma.done.wait [#allocation4], 256  }
0x101e   :  { %2288 = vsyncadd [#allocation4], 4294967040 }
0x101f   :  { %1880 = vsyncpa [#allocation3], 1 }
0x1020   :  { %1881 = vsyncpa [#allocation6], 1 }
0x1021   :  { %1882 = vsyncpa [#allocation4], 1 }

</bundles_post_ra>
